<compile_context>
chip_gen: v6e
topology: v6e:2x2x1
jax: 0.10.0
libtpu: 0.0.40
codegen_flags: <defaults>
</compile_context>

<pallas_src>
import jax
import jax.numpy as jnp
from jax.experimental import pallas as pl
from jax.experimental.pallas import tpu as pltpu

_EPS = 1e-5


# ----------------------------- tiling helpers ------------------------------ #

def _choose_chunk(hw, cap=1024):
    """Largest multiple-of-128 divisor of hw that is <= cap; else hw itself."""
    if hw <= cap:
        return hw
    c = (cap // 128) * 128
    while c >= 128:
        if hw % c == 0:
            return c
        c -= 128
    return hw  # odd spatial size: fall back to whole rows resident


def _choose_row_block(nc, cap=128):
    """Multiple-of-8 divisor of nc giving >=2 row blocks (megacore/pipelining),
    preferring larger blocks up to `cap`; falls back to the whole extent."""
    rb = min(cap, nc)
    rb -= rb % 8
    while rb >= 8:
        if nc % rb == 0 and nc // rb >= 2:
            return rb
        rb -= 8
    return nc


# ----------------------------- Pallas kernels ------------------------------ #

def _make_streamed_kernel(nc_total, hw, num_chunks, w_const, eps):
    """Chunked single-pass kernel for layers with H*W >= 128.

    Grid = (num_row_blocks, num_chunks); inputs are (rb, chunk) tiles of the
    (N*C, H*W) target / content features.  Output is one (1,1,1) weighted
    partial loss per row block.
    """
    inv_hw = 1.0 / hw
    inv_var = 1.0 / (hw - 1) if hw > 1 else 0.0
    scale = float(w_const) / float(nc_total)   # layer_w * global_w / (N*C)

    def kernel(t_ref, c_ref, o_ref, ts_acc, tq_acc, cs_acc, cq_acc):
        k = pl.program_id(1)

        @pl.when(k == 0)
        def _init():
            ts_acc[...] = jnp.zeros_like(ts_acc)
            tq_acc[...] = jnp.zeros_like(tq_acc)
            cs_acc[...] = jnp.zeros_like(cs_acc)
            cq_acc[...] = jnp.zeros_like(cq_acc)

        # Lane-wide single-pass accumulation: pure VALU work, no per-chunk
        # cross-lane reduce, feature data read exactly once.
        t = t_ref[...].astype(jnp.float32)
        c = c_ref[...].astype(jnp.float32)
        ts_acc[...] += t
        tq_acc[...] += t * t
        cs_acc[...] += c
        cq_acc[...] += c * c

        @pl.when(k == num_chunks - 1)
        def _finalize():
            # One cross-lane (XLU) reduce per accumulator, in the epilogue only.
            ts = jnp.sum(ts_acc[...], axis=1, keepdims=True)   # (rb, 1)
            tq = jnp.sum(tq_acc[...], axis=1, keepdims=True)
            cs = jnp.sum(cs_acc[...], axis=1, keepdims=True)
            cq = jnp.sum(cq_acc[...], axis=1, keepdims=True)
            mt = ts * inv_hw
            mc = cs * inv_hw
            # unbiased variance, clamped at 0 before +eps (single-pass form)
            vt = jnp.maximum(tq - ts * mt, 0.0) * inv_var
            vc = jnp.maximum(cq - cs * mc, 0.0) * inv_var
            st = jnp.sqrt(vt + eps)
            sc = jnp.sqrt(vc + eps)
            d = jnp.square(mt - mc) + jnp.square(st - sc)       # (rb, 1)
            part = jnp.sum(d, axis=0, keepdims=True) * scale    # (1, 1)
            o_ref[...] = part.reshape(1, 1, 1)

    return kernel


def _make_small_kernel(nc_total, hw, w_const, eps):
    """Whole-resident kernel for layers with H*W < 128, presented transposed
    as (H*W, N*C) so N*C is lane-dense; spatial reduce over sublanes."""
    inv_hw = 1.0 / hw
    inv_var = 1.0 / (hw - 1) if hw > 1 else 0.0
    scale = float(w_const) / float(nc_total)

    def kernel(t_ref, c_ref, o_ref):
        t = t_ref[...].astype(jnp.float32)                      # (HW, NC)
        c = c_ref[...].astype(jnp.float32)
        ts = jnp.sum(t, axis=0, keepdims=True)                  # (1, NC)
        tq = jnp.sum(t * t, axis=0, keepdims=True)
        cs = jnp.sum(c, axis=0, keepdims=True)
        cq = jnp.sum(c * c, axis=0, keepdims=True)
        mt = ts * inv_hw
        mc = cs * inv_hw
        vt = jnp.maximum(tq - ts * mt, 0.0) * inv_var
        vc = jnp.maximum(cq - cs * mc, 0.0) * inv_var
        st = jnp.sqrt(vt + eps)
        sc = jnp.sqrt(vc + eps)
        d = jnp.square(mt - mc) + jnp.square(st - sc)           # (1, NC)
        o_ref[...] = (jnp.sum(d, axis=1, keepdims=True) * scale).reshape(1, 1, 1)

    return kernel


# ------------------------------- wrapper ----------------------------------- #

def _layer_partial_loss(t, c, w_const, eps):
    """Weighted style-loss contribution of one layer (includes the global
    interested_weights factor folded into w_const). Returns a 0-d f32."""
    assert t.shape == c.shape and t.ndim == 4
    n, ch, h, w = t.shape
    nc, hw = n * ch, h * w

    t2 = t.reshape(nc, hw)          # contiguous NCHW -> (N*C, H*W): free
    c2 = c.reshape(nc, hw)

    if hw < 128:
        # Small spatial extent: transpose so N*C fills the 128 lanes
        # (avoids up-to-8x lane padding); tensor is tiny, transpose is cheap.
        t2 = jnp.transpose(t2)
        c2 = jnp.transpose(c2)
        kernel = _make_small_kernel(nc, hw, w_const, eps)
        out = pl.pallas_call(
            kernel,
            grid=(1,),
            in_specs=[pl.BlockSpec((hw, nc), lambda i: (0, 0)),
                      pl.BlockSpec((hw, nc), lambda i: (0, 0))],
            out_specs=pl.BlockSpec((1, 1, 1), lambda i: (0, 0, 0)),
            out_shape=jax.ShapeDtypeStruct((1, 1, 1), jnp.float32),
            compiler_params=pltpu.CompilerParams(
                dimension_semantics=("arbitrary",)),
        )(t2, c2)
        return out[0, 0, 0]

    # Streamed path: chunk the spatial (reduction) axis, block the N*C rows.
    chunk = _choose_chunk(hw)
    rb = _choose_row_block(nc)
    num_rb = nc // rb
    num_chunks = hw // chunk
    kernel = _make_streamed_kernel(nc, hw, num_chunks, w_const, eps)

    out = pl.pallas_call(
        kernel,
        grid=(num_rb, num_chunks),
        in_specs=[pl.BlockSpec((rb, chunk), lambda r, k: (r, k)),
                  pl.BlockSpec((rb, chunk), lambda r, k: (r, k))],
        out_specs=pl.BlockSpec((1, 1, 1), lambda r, k: (r, 0, 0)),
        out_shape=jax.ShapeDtypeStruct((num_rb, 1, 1), jnp.float32),
        scratch_shapes=[pltpu.VMEM((rb, chunk), jnp.float32)
                        for _ in range(4)],
        compiler_params=pltpu.CompilerParams(
            dimension_semantics=("parallel", "arbitrary")),
    )(t2, c2)
    return jnp.sum(out)


def adain_loss_forward(tF, cF, interested_layers, interested_layer_weights,
                       interested_weights, eps=_EPS):
    """Forward of AdaIN_LossCriterion. Returns a scalar f32 loss."""
    total = jnp.float32(0.0)
    gw = float(interested_weights)
    for i, layer in enumerate(interested_layers):
        # Keep the native HBM dtype (bf16 stays bf16); cast to f32 in-kernel.
        t = jnp.asarray(tF[layer])
        c = jnp.asarray(cF[layer])
        w_const = float(interested_layer_weights[i]) * gw
        total = total + _layer_partial_loss(t, c, w_const, eps)
    return total


# -------------------------- pure-JAX reference ------------------------------ #

def _reference_loss(tF, cF, interested_layers, layer_weights, interested_weights,
                    eps=_EPS):
    total = jnp.float32(0.0)
    for i, layer in enumerate(interested_layers):
        t = jnp.asarray(tF[layer], jnp.float32)
        c = jnp.asarray(cF[layer], jnp.float32)
        n, ch = t.shape[:2]
        tf = t.reshape(n, ch, -1)
        cf = c.reshape(n, ch, -1)
        mt = tf.mean(axis=2)
        mc = cf.mean(axis=2)
        st = jnp.sqrt(jnp.var(tf, axis=2, ddof=1) + eps)
        sc = jnp.sqrt(jnp.var(cf, axis=2, ddof=1) + eps)
        li = jnp.mean(jnp.square(mt - mc)) + jnp.mean(jnp.square(st - sc))
        total = total + layer_weights[i] * li
    return total * interested_weights


# ----------------------------------- main ----------------------------------- #

if __name__ == "__main__":
    key = jax.random.PRNGKey(0)

    # Small VGG-ish feature pyramid: three "interested layers".
    interested_layers = ["relu1_1", "relu2_1", "relu3_1"]
    shapes = {
        "relu1_1": (2, 32, 16, 16),   # NC = 64,  HW = 256  -> streamed path
        "relu2_1": (2, 64, 8, 8),     # NC = 128, HW = 64   -> lane-dense path
        "relu3_1": (2, 128, 4, 4),    # NC = 256, HW = 16   -> lane-dense path
    }
    tF, cF = {}, {}
    for name in interested_layers:
        key, k1, k2 = jax.random.split(key, 3)
        tF[name] = jax.random.normal(k1, shapes[name], jnp.float32)
        cF[name] = 1.0 + 0.5 * jax.random.normal(k2, shapes[name], jnp.float32)

    interested_layer_weights = [1.0, 0.75, 0.5]
    interested_weights = 2.0

    out = adain_loss_forward(tF, cF, interested_layers,
                             interested_layer_weights, interested_weights)
    out = jax.block_until_ready(out)

    ref = _reference_loss(tF, cF, interested_layers,
                          interested_layer_weights, interested_weights)

    assert jnp.isfinite(out), out
    assert jnp.allclose(out, ref, rtol=1e-4, atol=1e-6), (out, ref)
    print("KERNEL_OK")
</pallas_src>

<mosaic_0001>
module attributes {stable_mosaic.version = 11 : i64} {
  func.func @kernel(%arg0: i32, %arg1: i32, %arg2: memref<32x256xf32, #tpu.memory_space<vmem>>, %arg3: memref<32x256xf32, #tpu.memory_space<vmem>>, %arg4: memref<1x1x1xf32, #tpu.memory_space<vmem>>, %arg5: memref<32x256xf32, #tpu.memory_space<vmem>>, %arg6: memref<32x256xf32, #tpu.memory_space<vmem>>, %arg7: memref<32x256xf32, #tpu.memory_space<vmem>>, %arg8: memref<32x256xf32, #tpu.memory_space<vmem>>) attributes {dimension_semantics = [#tpu.dimension_semantics<parallel>, #tpu.dimension_semantics<arbitrary>], iteration_bounds = array<i64: 2, 1>, scalar_prefetch = 0 : i64, scratch_operands = 4 : i64, tpu.core_type = #tpu.core_type<tc>, window_params = [{transform_indices = @transform_0, window_bounds = array<i64: 32, 256>}, {transform_indices = @transform_1, window_bounds = array<i64: 32, 256>}, {transform_indices = @transform_2, window_bounds = array<i64: 1, 1, 1>}]} {
    %c0_i32 = arith.constant 0 : i32
    %0 = arith.cmpi eq, %arg1, %c0_i32 : i32
    %1 = arith.extui %0 : i1 to i32
    %c0_i32_0 = arith.constant 0 : i32
    %2 = arith.cmpi ne, %1, %c0_i32_0 : i32
    scf.if %2 {
      %cst = arith.constant 0.000000e+00 : f32
      %22 = vector.broadcast %cst : f32 to vector<32x256xf32>
      %c0_22 = arith.constant 0 : index
      %c0_23 = arith.constant 0 : index
      %23 = vector.load %arg5[%c0_22, %c0_23] : memref<32x256xf32, #tpu.memory_space<vmem>>, vector<32x256xf32>
      tpu.vector_store %arg5[%c0_22, %c0_23], %22 {strides = array<i32>} : memref<32x256xf32, #tpu.memory_space<vmem>>, vector<32x256xf32>,
      %cst_24 = arith.constant 0.000000e+00 : f32
      %24 = vector.broadcast %cst_24 : f32 to vector<32x256xf32>
      %c0_25 = arith.constant 0 : index
      %c0_26 = arith.constant 0 : index
      %25 = vector.load %arg6[%c0_25, %c0_26] : memref<32x256xf32, #tpu.memory_space<vmem>>, vector<32x256xf32>
      tpu.vector_store %arg6[%c0_25, %c0_26], %24 {strides = array<i32>} : memref<32x256xf32, #tpu.memory_space<vmem>>, vector<32x256xf32>,
      %cst_27 = arith.constant 0.000000e+00 : f32
      %26 = vector.broadcast %cst_27 : f32 to vector<32x256xf32>
      %c0_28 = arith.constant 0 : index
      %c0_29 = arith.constant 0 : index
      %27 = vector.load %arg7[%c0_28, %c0_29] : memref<32x256xf32, #tpu.memory_space<vmem>>, vector<32x256xf32>
      tpu.vector_store %arg7[%c0_28, %c0_29], %26 {strides = array<i32>} : memref<32x256xf32, #tpu.memory_space<vmem>>, vector<32x256xf32>,
      %cst_30 = arith.constant 0.000000e+00 : f32
      %28 = vector.broadcast %cst_30 : f32 to vector<32x256xf32>
      %c0_31 = arith.constant 0 : index
      %c0_32 = arith.constant 0 : index
      %29 = vector.load %arg8[%c0_31, %c0_32] : memref<32x256xf32, #tpu.memory_space<vmem>>, vector<32x256xf32>
      tpu.vector_store %arg8[%c0_31, %c0_32], %28 {strides = array<i32>} : memref<32x256xf32, #tpu.memory_space<vmem>>, vector<32x256xf32>,
    } else {
    }
    %c0 = arith.constant 0 : index
    %c0_1 = arith.constant 0 : index
    %3 = vector.load %arg2[%c0, %c0_1] : memref<32x256xf32, #tpu.memory_space<vmem>>, vector<32x256xf32>
    %c0_2 = arith.constant 0 : index
    %c0_3 = arith.constant 0 : index
    %4 = vector.load %arg3[%c0_2, %c0_3] : memref<32x256xf32, #tpu.memory_space<vmem>>, vector<32x256xf32>
    %c0_4 = arith.constant 0 : index
    %c0_5 = arith.constant 0 : index
    %5 = vector.load %arg5[%c0_4, %c0_5] : memref<32x256xf32, #tpu.memory_space<vmem>>, vector<32x256xf32>
    %6 = arith.addf %5, %3 : vector<32x256xf32>
    %c0_6 = arith.constant 0 : index
    %c0_7 = arith.constant 0 : index
    %7 = vector.load %arg5[%c0_6, %c0_7] : memref<32x256xf32, #tpu.memory_space<vmem>>, vector<32x256xf32>
    tpu.vector_store %arg5[%c0_6, %c0_7], %6 {strides = array<i32>} : memref<32x256xf32, #tpu.memory_space<vmem>>, vector<32x256xf32>,
    %c0_8 = arith.constant 0 : index
    %c0_9 = arith.constant 0 : index
    %8 = vector.load %arg6[%c0_8, %c0_9] : memref<32x256xf32, #tpu.memory_space<vmem>>, vector<32x256xf32>
    %9 = arith.mulf %3, %3 : vector<32x256xf32>
    %10 = arith.addf %8, %9 : vector<32x256xf32>
    %c0_10 = arith.constant 0 : index
    %c0_11 = arith.constant 0 : index
    %11 = vector.load %arg6[%c0_10, %c0_11] : memref<32x256xf32, #tpu.memory_space<vmem>>, vector<32x256xf32>
    tpu.vector_store %arg6[%c0_10, %c0_11], %10 {strides = array<i32>} : memref<32x256xf32, #tpu.memory_space<vmem>>, vector<32x256xf32>,
    %c0_12 = arith.constant 0 : index
    %c0_13 = arith.constant 0 : index
    %12 = vector.load %arg7[%c0_12, %c0_13] : memref<32x256xf32, #tpu.memory_space<vmem>>, vector<32x256xf32>
    %13 = arith.addf %12, %4 : vector<32x256xf32>
    %c0_14 = arith.constant 0 : index
    %c0_15 = arith.constant 0 : index
    %14 = vector.load %arg7[%c0_14, %c0_15] : memref<32x256xf32, #tpu.memory_space<vmem>>, vector<32x256xf32>
    tpu.vector_store %arg7[%c0_14, %c0_15], %13 {strides = array<i32>} : memref<32x256xf32, #tpu.memory_space<vmem>>, vector<32x256xf32>,
    %c0_16 = arith.constant 0 : index
    %c0_17 = arith.constant 0 : index
    %15 = vector.load %arg8[%c0_16, %c0_17] : memref<32x256xf32, #tpu.memory_space<vmem>>, vector<32x256xf32>
    %16 = arith.mulf %4, %4 : vector<32x256xf32>
    %17 = arith.addf %15, %16 : vector<32x256xf32>
    %c0_18 = arith.constant 0 : index
    %c0_19 = arith.constant 0 : index
    %18 = vector.load %arg8[%c0_18, %c0_19] : memref<32x256xf32, #tpu.memory_space<vmem>>, vector<32x256xf32>
    tpu.vector_store %arg8[%c0_18, %c0_19], %17 {strides = array<i32>} : memref<32x256xf32, #tpu.memory_space<vmem>>, vector<32x256xf32>,
    %c0_i32_20 = arith.constant 0 : i32
    %19 = arith.cmpi eq, %arg1, %c0_i32_20 : i32
    %20 = arith.extui %19 : i1 to i32
    %c0_i32_21 = arith.constant 0 : i32
    %21 = arith.cmpi ne, %20, %c0_i32_21 : i32
    scf.if %21 {
      %c0_22 = arith.constant 0 : index
      %c0_23 = arith.constant 0 : index
      %22 = vector.load %arg5[%c0_22, %c0_23] : memref<32x256xf32, #tpu.memory_space<vmem>>, vector<32x256xf32>
      %cst = arith.constant dense<0.000000e+00> : vector<32xf32>
      %23 = vector.multi_reduction <add>, %22, %cst [1] : vector<32x256xf32> to vector<32xf32>
      %24 = vector.shape_cast %23 : vector<32xf32> to vector<32x1xf32>
      %c0_24 = arith.constant 0 : index
      %c0_25 = arith.constant 0 : index
      %25 = vector.load %arg6[%c0_24, %c0_25] : memref<32x256xf32, #tpu.memory_space<vmem>>, vector<32x256xf32>
      %cst_26 = arith.constant dense<0.000000e+00> : vector<32xf32>
      %26 = vector.multi_reduction <add>, %25, %cst_26 [1] : vector<32x256xf32> to vector<32xf32>
      %27 = vector.shape_cast %26 : vector<32xf32> to vector<32x1xf32>
      %c0_27 = arith.constant 0 : index
      %c0_28 = arith.constant 0 : index
      %28 = vector.load %arg7[%c0_27, %c0_28] : memref<32x256xf32, #tpu.memory_space<vmem>>, vector<32x256xf32>
      %cst_29 = arith.constant dense<0.000000e+00> : vector<32xf32>
      %29 = vector.multi_reduction <add>, %28, %cst_29 [1] : vector<32x256xf32> to vector<32xf32>
      %30 = vector.shape_cast %29 : vector<32xf32> to vector<32x1xf32>
      %c0_30 = arith.constant 0 : index
      %c0_31 = arith.constant 0 : index
      %31 = vector.load %arg8[%c0_30, %c0_31] : memref<32x256xf32, #tpu.memory_space<vmem>>, vector<32x256xf32>
      %cst_32 = arith.constant dense<0.000000e+00> : vector<32xf32>
      %32 = vector.multi_reduction <add>, %31, %cst_32 [1] : vector<32x256xf32> to vector<32xf32>
      %33 = vector.shape_cast %32 : vector<32xf32> to vector<32x1xf32>
      %cst_33 = arith.constant 3.906250e-03 : f32
      %34 = vector.broadcast %cst_33 : f32 to vector<32x1xf32>
      %35 = arith.mulf %24, %34 : vector<32x1xf32>
      %cst_34 = arith.constant 3.906250e-03 : f32
      %36 = vector.broadcast %cst_34 : f32 to vector<32x1xf32>
      %37 = arith.mulf %30, %36 : vector<32x1xf32>
      %38 = arith.mulf %24, %35 : vector<32x1xf32>
      %39 = arith.subf %27, %38 : vector<32x1xf32>
      %cst_35 = arith.constant 0.000000e+00 : f32
      %40 = vector.broadcast %cst_35 : f32 to vector<32x1xf32>
      %41 = arith.maximumf %39, %40 : vector<32x1xf32>
      %cst_36 = arith.constant 0.00392156886 : f32
      %42 = vector.broadcast %cst_36 : f32 to vector<32x1xf32>
      %43 = arith.mulf %41, %42 : vector<32x1xf32>
      %44 = arith.mulf %30, %37 : vector<32x1xf32>
      %45 = arith.subf %33, %44 : vector<32x1xf32>
      %cst_37 = arith.constant 0.000000e+00 : f32
      %46 = vector.broadcast %cst_37 : f32 to vector<32x1xf32>
      %47 = arith.maximumf %45, %46 : vector<32x1xf32>
      %cst_38 = arith.constant 0.00392156886 : f32
      %48 = vector.broadcast %cst_38 : f32 to vector<32x1xf32>
      %49 = arith.mulf %47, %48 : vector<32x1xf32>
      %cst_39 = arith.constant 9.99999974E-6 : f32
      %50 = vector.broadcast %cst_39 : f32 to vector<32x1xf32>
      %51 = arith.addf %43, %50 : vector<32x1xf32>
      %52 = math.sqrt %51 : vector<32x1xf32>
      %cst_40 = arith.constant 9.99999974E-6 : f32
      %53 = vector.broadcast %cst_40 : f32 to vector<32x1xf32>
      %54 = arith.addf %49, %53 : vector<32x1xf32>
      %55 = math.sqrt %54 : vector<32x1xf32>
      %56 = arith.subf %35, %37 : vector<32x1xf32>
      %57 = arith.mulf %56, %56 : vector<32x1xf32>
      %58 = arith.subf %52, %55 : vector<32x1xf32>
      %59 = arith.mulf %58, %58 : vector<32x1xf32>
      %60 = arith.addf %57, %59 : vector<32x1xf32>
      %cst_41 = arith.constant dense<0.000000e+00> : vector<1xf32>
      %61 = vector.multi_reduction <add>, %60, %cst_41 [0] : vector<32x1xf32> to vector<1xf32>
      %62 = vector.shape_cast %61 : vector<1xf32> to vector<1x1xf32>
      %cst_42 = arith.constant 3.125000e-02 : f32
      %63 = vector.broadcast %cst_42 : f32 to vector<1x1xf32>
      %64 = arith.mulf %62, %63 : vector<1x1xf32>
      %65 = vector.shape_cast %64 : vector<1x1xf32> to vector<1x1x1xf32>
      %c0_43 = arith.constant 0 : index
      %c0_44 = arith.constant 0 : index
      %c0_45 = arith.constant 0 : index
      %66 = vector.load %arg4[%c0_43, %c0_44, %c0_45] : memref<1x1x1xf32, #tpu.memory_space<vmem>>, vector<1x1x1xf32>
      tpu.vector_store %arg4[%c0_43, %c0_44, %c0_45], %65 {strides = array<i32>} : memref<1x1x1xf32, #tpu.memory_space<vmem>>, vector<1x1x1xf32>,
    } else {
    }
    return
  }
  func.func @transform_0(%arg0: i32, %arg1: i32) -> (i32, i32) {
    %c0_i32 = arith.constant 0 : i32
    return %arg0, %arg1 : i32, i32
  }
  func.func @transform_1(%arg0: i32, %arg1: i32) -> (i32, i32) {
    %c0_i32 = arith.constant 0 : i32
    return %arg0, %arg1 : i32, i32
  }
  func.func @transform_2(%arg0: i32, %arg1: i32) -> (i32, i32, i32) {
    %c0_i32 = arith.constant 0 : i32
    %c0_i32_0 = arith.constant 0 : i32
    %c0_i32_1 = arith.constant 0 : i32
    return %arg0, %c0_i32, %c0_i32_0 : i32, i32, i32
  }
}

</mosaic_0001>

<bundles_post_ra>
// kernel: tpu_custom_call.1
= control target key start
LH: loop header
LB: loop body
LE: loop exit
PB: predicated region body
PF: predicated region fallthrough
CT: control target
= control target key end

     0   :  { %7 = vsyncpa [#allocation7], 0  ;;  %s1145_s0 = inlined_call_operand.hbm [shape: f32[64,256], index: 0, kind: input, shape index: {}]   ;;  %s1146_s1 = inlined_call_operand.hbm [shape: f32[64,256], index: 1, kind: input, shape index: {}]   ;;  %s1147_s2 = inlined_call_operand.vmem [shape: f32[2,1,1], index: 2, kind: output, shape index: {}]  }
   0x1   :  { %9 = vsyncpa [#allocation7 + $0x1], 0 }
   0x2   :  { %10 = vsyncpa [#allocation9], 0 }
   0x3   :  { %12 = vsyncpa [#allocation9 + $0x1], 0  ;;  %s935_s9 = smov 0   ;;  %s937_s10 = smov 0  }
   0x4   :  { %s939_s11 = smov 0   ;;  %s941_s12 = smov 0  }
   0x5   :  { %s943_s13 = smov 0   ;;  %s945_s14 = smov 0  }
   0x6 LB: > { %s705_s15 = sadd.s32 4294967295, %s914_s14   ;;  %s30_s16 = sadd.s32 1, %s910_s13  ;;  %s914_s14 = sphi %s945_s14, %s18_s14   ;;  %s910_s13 = sphi %s943_s13, %s1156_s13   ;;  %s906_s12 = sphi %s941_s12, %s1155_s12   ;;  %s902_s11 = sphi %s939_s11, %s1154_s11   ;;  %s898_s10 = sphi %s937_s10, %s1153_s10   ;;  %s894_s9 = sphi %s935_s9, %s1152_s9  }
   0x7   : > { %p32_p0 = scmp.ge.s32.totalorder %s30_s16, 2  ;;  %s39_s17 = sadd.s32 1, %s902_s11 }
   0x8   : > { %p46_p1 = scmp.ne.s32.totalorder %s902_s11, %s898_s10  ;;  %p47_p2 = scmp.eq.s32.totalorder %s914_s14, 0 }
   0x9   : > { %s1158_s16 = smov (%p32_p0, %s30_s16), 0  ;;  %p52_p4 = scmp.ne.s32.totalorder %s898_s10, %s894_s9 }
   0xa   : > { %p971_p3 = por %p47_p2, %p46_p1  ;;  %s34_s19 = ssub.s32 %s910_s13, %s1158_s16 }
   0xb   : > { %p53_p5 = scmp.eq.s32.totalorder %s705_s15, 0  ;;  %p37_p6 = scmp.eq.s32.totalorder %s34_s19, 0 }
   0xc   : > { %p737_p8 = scmp.lt.s32.totalorder %s914_s14, 2  ;;  %s987_s22 = sand.u32 1, %s902_s11  }
   0xd   : > { %p978_p7 = por %p53_p5, %p52_p4  ;;  %s723_s23 = sshll.u32 %s910_s13, 10 }
   0xe   : > { %s984_s21 = scalar_select %p37_p6, %s902_s11, %s39_s17  }
   0xf   : > { %s709_s24 = sshll.u32 %s987_s22, 6  ;;  %s143_s27 = scalar_lea.hbm %s1145_s0, %s723_s23 }
  0x10   : > { %s134_s28 = scalar_lea.vmem [#allocation6], %s709_s24  ;;  %p998_p9 = pnand %p737_p8, %p971_p3 }
  0x11   : > { %s144_s29 = sshll.u32 %s134_s28, 4  ;;  %s131_s3 = scalar_lea.sflag [#allocation7], %s987_s22  ;;  %s145_s29 = int_to_ptr.vmem [resolvable:$true] %s144_s29 }
  0x12   : > { %p806_p10 = pneg %p998_p9  ;;  %s817_s4 = scalar_lea.vmem %s145_s29, 1024 }
  0x13   : > { %p818_p11 = scmp.ne.s32.totalorder %s145_s29, %s817_s4  ;;  %s916_s5 = smov [#allocation6]  }
  0x14   : > { %s822_s6 = sshll.u32 %s916_s5, 4  ;;  %s823_s6 = int_to_ptr.vmem [resolvable:$false] %s822_s6 }
  0x15   : > { %p820_p12 = pnand %p818_p11, %p806_p10  ;;  %s824_s7 = scalar_lea.vmem %s823_s6, 2048 }
  0x16   : > { %p825_p0 = scmp.lt.s32.totalorder %s145_s29, %s823_s6  ;;  %p826_p1 = scmp.lt.s32.totalorder %s824_s7, %s817_s4 }
  0x17   : > { %p821_p13 = pneg %p820_p12 }
  0x18   : > { %p827_p2 = por %p826_p1, %p825_p0 }
  0x1a   : > { %p828_p3 = pnand %p827_p2, %p821_p13 }
  0x1c   : > { %831 = shalt.err (!%p828_p3)
}
  0x1d   : > { %s917_s8 = smov 256   ;;  %s918_s9 = smov 16  }
  0x1e   : > { %733 = dma.hbm_to_vmem [thread:$0]  (!%p998_p9), %s143_s27, 1024, %s145_s29, %s131_s3, %s917_s8, %s917_s8, %s918_s9  }
  0x1f   : > { %p717_p4 = scmp.ge.s32.totalorder %s914_s14, 1  ;;  %p176_p5 = scmp.lt.s32.totalorder %s914_s14, 3 }
  0x20   : > { %s167_s19 = scalar_lea.hbm %s1146_s1, %s723_s23  ;;  %s158_s25 = scalar_lea.vmem [#allocation8], %s709_s24 }
  0x21   : > { %p1012_p6 = pnand %p717_p4, %p176_p5  ;;  %s168_s26 = sshll.u32 %s158_s25, 4  ;;  %s169_s26 = int_to_ptr.vmem [resolvable:$true] %s168_s26 }
  0x22   : > { %s155_s28 = scalar_lea.sflag [#allocation9], %s987_s22  ;;  %s845_s4 = scalar_lea.vmem %s169_s26, 1024 }
  0x23   : > { %p846_p8 = scmp.ne.s32.totalorder %s169_s26, %s845_s4  ;;  %s919_s27 = smov [#allocation8]  }
  0x24   : > { %s850_s29 = sshll.u32 %s919_s27, 4  ;;  %s851_s29 = int_to_ptr.vmem [resolvable:$false] %s850_s29 }
  0x25   : > { %p848_p11 = pnand %p846_p8, %p806_p10  ;;  %s852_s3 = scalar_lea.vmem %s851_s29, 2048 }
  0x26   : > { %p853_p13 = scmp.lt.s32.totalorder %s169_s26, %s851_s29  ;;  %p854_p0 = scmp.lt.s32.totalorder %s852_s3, %s845_s4 }
  0x27   : > { %p849_p12 = pneg %p848_p11 }
  0x28   : > { %p855_p1 = por %p854_p0, %p853_p13 }
  0x2a   : > { %p856_p2 = pnand %p855_p1, %p849_p12 }
  0x2c   : > { %859 = shalt.err (!%p856_p2)
}
  0x2d   : > { %736 = dma.hbm_to_vmem [thread:$0]  (!%p998_p9), %s167_s19, 1024, %s169_s26, %s155_s28, %s917_s8, %s917_s8, %s918_s9  }
  0x2e   : > { %180 = sbr.rel (%p1012_p6) target bundleno = 274 (0x112), region = 28  ;;  %s182_s22 = sand.u32 (!%p1012_p6), 1, %s898_s10  }
  0x2f   : > { %s718_s23 = sshll.u32 (!%p1012_p6), %s182_s22, 6  ;;  %s183_s24 = scalar_lea.sflag (!%p1012_p6), [#allocation7], %s182_s22 }
  0x30   : > { %s1030_s5 = scalar_lea.vmem (!%p1012_p6), [#allocation6], %s718_s23 }
  0x33   : > { %885 = dma.done.wait (%p978_p7), %s183_s24, 1024  }
  0x34   : > { %887 = vsyncadd (%p978_p7), %s183_s24, 4294966272  ;;  %s192_s6 = scalar_lea.sflag [#allocation9], %s182_s22  ;;  %s1036_s7 = scalar_lea.vmem [#allocation8], %s718_s23 }
  0x35   : > { %889 = dma.done.wait (%p978_p7), %s192_s6, 1024  }
  0x36   : > { %891 = vsyncadd (%p978_p7), %s192_s6, 4294966272  ;;  %v270_v0 = vld [vmem:[%s1036_s7] sm:$0xff]  ;;  %v271_v1 = vld [vmem:[%s1036_s7 + $0x8] sm:$0xff]  ;;  %p223_p7 = scmp.lt.s32.totalorder %s906_s12, 1 }
  0x37   : > { %v262_v2 = vld [vmem:[%s1030_s5] sm:$0xff]  ;;  %v441_v3 = vadd.f32 %v271_v1, %v270_v0  ;;  %v263_v4 = vld [vmem:[%s1030_s5 + $0x8] sm:$0xff]  ;;  %v272_v5 = vld [vmem:[%s1036_s7 + $0x10] sm:$0xff]  ;;  %v367_v31 = vmul.f32 %v271_v1, %v271_v1  ;;  %v366_v32 = vmul.f32 %v270_v0, %v270_v0 }
  0x38   : > { %v273_v6 = vld [vmem:[%s1036_s7 + $0x18] sm:$0xff]  ;;  %v401_v7 = vadd.f32 %v263_v4, %v262_v2  ;;  %v264_v8 = vld [vmem:[%s1030_s5 + $0x10] sm:$0xff]  ;;  %v274_v12 = vld [vmem:[%s1036_s7 + $0x20] sm:$0xff]  ;;  %v311_v16 = vmul.f32 %v263_v4, %v263_v4  ;;  %v310_v17 = vmul.f32 %v262_v2, %v262_v2  ;;  %v368_v29 = vmul.f32 %v272_v5, %v272_v5  ;;  %s1160_s12 = smov (!%p223_p7, %s906_s12), 1 }
  0x39   : > { %v265_v9 = vld [vmem:[%s1030_s5 + $0x18] sm:$0xff]  ;;  %442 = vadd.xlane.f32.xlu1 %v441_v3  ;;  %v444_v10 = vadd.f32 %v273_v6, %v272_v5  ;;  %v275_v13 = vld [vmem:[%s1036_s7 + $0x28] sm:$0xff]  ;;  %v266_v14 = vld [vmem:[%s1030_s5 + $0x20] sm:$0xff]  ;;  %v312_v24 = vmul.f32 %v264_v8, %v264_v8  ;;  %v369_v30 = vmul.f32 %v273_v6, %v273_v6  ;;  %v370_v35 = vmul.f32 %v274_v12, %v274_v12  ;;  %s225_s8 = scalar_lea.vmem %s1147_s2, %s1160_s12 }
  0x3a   : > { %402 = vadd.xlane.f32.xlu0 %v401_v7  ;;  %v404_v11 = vadd.f32 %v265_v9, %v264_v8  ;;  %v267_v15 = vld [vmem:[%s1030_s5 + $0x28] sm:$0xff]  ;;  %v447_v18 = vadd.f32 %v275_v13, %v274_v12  ;;  %v268_v20 = vld [vmem:[%s1030_s5 + $0x30] sm:$0xff]  ;;  %v269_v21 = vld [vmem:[%s1030_s5 + $0x38] sm:$0xff]  ;;  %v421_v22 = vadd.f32 %v311_v16, %v310_v17  ;;  %v313_v25 = vmul.f32 %v265_v9, %v265_v9 }
  0x3b   : > { %v407_v19 = vadd.f32 %v267_v15, %v266_v14  ;;  %v410_v23 = vadd.f32 %v269_v21, %v268_v20  ;;  %v276_v26 = vld [vmem:[%s1036_s7 + $0x30] sm:$0xff]  ;;  %v277_v27 = vld [vmem:[%s1036_s7 + $0x38] sm:$0xff]  ;;  %v464_v34 = vadd.f32 %v369_v30, %v368_v29  ;;  %v371_v36 = vmul.f32 %v275_v13, %v275_v13 }
  0x3c   : > { %v450_v28 = vadd.f32 %v277_v27, %v276_v26  ;;  %v424_v33 = vadd.f32 %v313_v25, %v312_v24  ;;  %v461_v37 = vadd.f32 %v367_v31, %v366_v32  ;;  %v314_v38 = vmul.f32 %v266_v14, %v266_v14 }
  0x3d   : > { %445 = vadd.xlane.f32.xlu1 %v444_v10  ;;  %v315_v39 = vmul.f32 %v267_v15, %v267_v15  ;;  %v467_v40 = vadd.f32 %v371_v36, %v370_v35  ;;  %v372_v41 = vmul.f32 %v276_v26, %v276_v26  ;;  %v373_v42 = vmul.f32 %v277_v27, %v277_v27 }
  0x3e   : > { %405 = vadd.xlane.f32.xlu0 %v404_v11  ;;  %v316_v44 = vmul.f32 %v268_v20, %v268_v20  ;;  %v317_v45 = vmul.f32 %v269_v21, %v269_v21 }
  0x3f   : > { %v427_v43 = vadd.f32 %v315_v39, %v314_v38  ;;  %v470_v46 = vadd.f32 %v373_v42, %v372_v41 }
  0x40   : > { %v430_v47 = vadd.f32 %v317_v45, %v316_v44 }
  0x41   : > { %448 = vadd.xlane.f32.xlu1 %v447_v18 }
  0x42   : > { %408 = vadd.xlane.f32.xlu0 %v407_v19 }
  0x45   : > { %422 = vadd.xlane.f32.xlu1 %v421_v22 }
  0x46   : > { %411 = vadd.xlane.f32.xlu0 %v410_v23 }
  0x49   : > { %451 = vadd.xlane.f32.xlu1 %v450_v28 }
  0x4a   : > { %425 = vadd.xlane.f32.xlu0 %v424_v33 }
  0x4d   : > { %465 = vadd.xlane.f32.xlu1 %v464_v34 }
  0x4e   : > { %462 = vadd.xlane.f32.xlu0 %v461_v37 }
  0x51   : > { %468 = vadd.xlane.f32.xlu1 %v467_v40 }
  0x52   : > { %428 = vadd.xlane.f32.xlu0 %v427_v43 }
  0x55   : > { %471 = vadd.xlane.f32.xlu1 %v470_v46 }
  0x56   : > { %431 = vadd.xlane.f32.xlu0 %v430_v47 }
  0xc2   : > { %v443_v48 = vpop.xlane.xlu1 %442 }
  0xc3   : > { %v403_v49 = vpop.xlane.xlu0 %402  ;;  %v477_v61 = vmul.f32 0.00390625, %v443_v48 }
  0xc4   : > { %v1058_v52 = vmul.f32 0.00390625, %v403_v49 }
  0xc5   : > { %v497_v5 = vmul.f32 %v477_v61, %v443_v48 }
  0xc6   : > { %v446_v50 = vpop.xlane.xlu1 %445  ;;  %v481_v55 = vmul.f32 %v1058_v52, %v403_v49 }
  0xc7   : > { %v406_v51 = vpop.xlane.xlu0 %405  ;;  %v1063_v62 = vmul.f32 0.00390625, %v446_v50 }
  0xc8   : > { %v1061_v56 = vmul.f32 0.00390625, %v406_v51 }
  0xc9   : > { %v498_v6 = vmul.f32 %v1063_v62, %v446_v50  ;;  %v577_v50 = vsub.f32 %v1058_v52, %v477_v61 }
  0xca   : > { %v449_v53 = vpop.xlane.xlu1 %448  ;;  %v482_v63 = vmul.f32 %v1061_v56, %v406_v51 }
  0xcb   : > { %v409_v54 = vpop.xlane.xlu0 %408  ;;  %v479_v4 = vmul.f32 0.00390625, %v449_v53 }
  0xcc   : > { %v475_v9 = vmul.f32 0.00390625, %v409_v54 }
  0xcd   : > { %v499_v16 = vmul.f32 %v479_v4, %v449_v53 }
  0xce   : > { %v423_v57 = vpop.xlane.xlu1 %422  ;;  %v483_v22 = vmul.f32 %v475_v9, %v409_v54  ;;  %v581_v54 = vmul.f32 %v577_v50, %v577_v50 }
  0xcf   : > { %v412_v58 = vpop.xlane.xlu0 %411  ;;  %v485_v59 = vsub.f32 %v423_v57, %v481_v55  ;;  %v578_v55 = vsub.f32 %v1061_v56, %v1063_v62  ;;  %v579_v57 = vsub.f32 %v475_v9, %v479_v4 }
  0xd0   : > { %v1071_v17 = vmul.f32 0.00390625, %v412_v58 }
  0xd1   : > { %v489_v60 = vmax.f32 %v485_v59, 0.0 }
  0xd2   : > { %v452_v0 = vpop.xlane.xlu1 %451  ;;  %v484_v30 = vmul.f32 %v1071_v17, %v412_v58 }
  0xd3   : > { %v493_v1 = vmul.f32 0.003921569, %v489_v60  ;;  %v426_v2 = vpop.xlane.xlu0 %425  ;;  %v1069_v13 = vmul.f32 0.00390625, %v452_v0 }
  0xd4   : > { %v486_v3 = vsub.f32 %v426_v2, %v482_v63 }
  0xd5   : > { %v1067_v10 = vadd.f32 1e-05, %v493_v1  ;;  %v500_v25 = vmul.f32 %v1069_v13, %v452_v0 }
  0xd6   : > { %v490_v7 = vmax.f32 %v486_v3, 0.0  ;;  %v466_v8 = vpop.xlane.xlu1 %465 }
  0xd7   : > { %v463_v11 = vpop.xlane.xlu0 %462  ;;  %v502_v15 = vsub.f32 %v466_v8, %v498_v6  ;;  %788 = vrsqrt.f32 %v1067_v10  ;;  %vm519_vm0 = vcmp.eq.f32.partialorder %v1067_v10, inf  ;;  %vm521_vm1 = vcmp.eq.f32.partialorder %v1067_v10, 0.0 }
  0xd8   : > { %v494_v12 = vmul.f32 0.003921569, %v490_v7  ;;  %v501_v14 = vsub.f32 %v463_v11, %v497_v5  ;;  %v522_v52 = vand.u32 2147483648, %v1067_v10 }
  0xd9   : > { %v506_v20 = vmax.f32 %v502_v15, 0.0 }
  0xda   : > { %v1073_v18 = vadd.f32 1e-05, %v494_v12  ;;  %v505_v19 = vmax.f32 %v501_v14, 0.0  ;;  %v469_v21 = vpop.xlane.xlu1 %468  ;;  %v582_v14 = vmul.f32 %v578_v55, %v578_v55 }
  0xdb   : > { %v429_v23 = vpop.xlane.xlu0 %428  ;;  %v503_v24 = vsub.f32 %v469_v21, %v499_v16  ;;  %v510_v27 = vmul.f32 0.003921569, %v506_v20 }
  0xdc   : > { %790 = vrsqrt.f32 %v1073_v18  ;;  %v509_v26 = vmul.f32 0.003921569, %v505_v19  ;;  %v487_v28 = vsub.f32 %v429_v23, %v483_v22  ;;  %vm526_vm2 = vcmp.eq.f32.partialorder %v1073_v18, inf }
  0xdd   : > { %v507_v29 = vmax.f32 %v503_v24, 0.0  ;;  %v546_v33 = vadd.f32 1e-05, %v510_v27  ;;  %vm528_vm3 = vcmp.eq.f32.partialorder %v1073_v18, 0.0  ;;  %v529_v61 = vand.u32 2147483648, %v1073_v18 }
  0xde   : > { %v472_v31 = vpop.xlane.xlu1 %471  ;;  %v545_v32 = vadd.f32 1e-05, %v509_v26  ;;  %v491_v34 = vmax.f32 %v487_v28, 0.0  ;;  %v583_v19 = vmul.f32 %v579_v57, %v579_v57  ;;  %v580_v24 = vsub.f32 %v1071_v17, %v1069_v13 }
  0xdf   : > { %v432_v35 = vpop.xlane.xlu0 %431  ;;  %v504_v36 = vsub.f32 %v472_v31, %v500_v25  ;;  %v511_v37 = vmul.f32 0.003921569, %v507_v29  ;;  %vm558_vm6 = vcmp.eq.f32.partialorder %v546_v33, inf  ;;  %v561_v2 = vand.u32 2147483648, %v546_v33 }
  0xe0   : > { %v488_v38 = vsub.f32 %v432_v35, %v484_v30  ;;  %792 = vrsqrt.f32 %v545_v32  ;;  %v495_v39 = vmul.f32 0.003921569, %v491_v34  ;;  %vm551_vm4 = vcmp.eq.f32.partialorder %v545_v32, inf }
  0xe1   : > { %794 = vrsqrt.f32 %v546_v33  ;;  %v547_v40 = vadd.f32 1e-05, %v511_v37  ;;  %v508_v42 = vmax.f32 %v504_v36, 0.0  ;;  %v554_v62 = vand.u32 2147483648, %v545_v32 }
  0xe2   : > { %v492_v41 = vmax.f32 %v488_v38, 0.0  ;;  %v1079_v43 = vadd.f32 1e-05, %v495_v39  ;;  %vm553_vm5 = vcmp.eq.f32.partialorder %v545_v32, 0.0  ;;  %vm560_vm7 = vcmp.eq.f32.partialorder %v546_v33, 0.0 }
  0xe3   : > { %796 = vrsqrt.f32 %v547_v40  ;;  %v512_v45 = vmul.f32 0.003921569, %v508_v42  ;;  %vm565_vm8 = vcmp.eq.f32.partialorder %v547_v40, inf  ;;  %v568_v16 = vand.u32 2147483648, %v547_v40 }
  0xe4   : > { %v496_v44 = vmul.f32 0.003921569, %v492_v41  ;;  %798 = vrsqrt.f32 %v1079_v43  ;;  %v789_v46 = vpop.eup %788  ;;  %vm567_vm9 = vcmp.eq.f32.partialorder %v547_v40, 0.0  ;;  %vm533_vm10 = vcmp.eq.f32.partialorder %v1079_v43, inf }
  0xe5   : > { %v1084_v48 = vadd.f32 1e-05, %v512_v45  ;;  %v518_v51 = vmul.f32 %v789_v46, %v1067_v10  ;;  %v536_v22 = vand.u32 2147483648, %v1079_v43  ;;  %vm535_vm11 = vcmp.eq.f32.partialorder %v1079_v43, 0.0 }
  0xe6   : > { %v1082_v47 = vadd.f32 1e-05, %v496_v44  ;;  %v584_v41 = vmul.f32 %v580_v24, %v580_v24 }
  0xe7   : > { %v520_v60 = vsel %vm519_vm0, %v1067_v10, %v518_v51  ;;  %vm572_vm14 = vcmp.eq.f32.partialorder %v1084_v48, inf  ;;  %vm574_vm15 = vcmp.eq.f32.partialorder %v1084_v48, 0.0  ;;  %vm607_vm0 = vcmask 0  }
  0xe8   : > { %800 = vrsqrt.f32 %v1082_v47  ;;  %v523_v4 = vsel %vm521_vm1, %v522_v52, %v520_v60  ;;  %vm540_vm12 = vcmp.eq.f32.partialorder %v1082_v47, inf  ;;  %vm542_vm13 = vcmp.eq.f32.partialorder %v1082_v47, 0.0 }
  0xe9   : > { %v791_v49 = vpop.eup %790  ;;  %802 = vrsqrt.f32 %v1084_v48  ;;  %v543_v31 = vand.u32 2147483648, %v1082_v47 }
  0xea   : > { %v525_v53 = vmul.f32 %v791_v49, %v1073_v18 }
  0xec   : > { %v527_v56 = vsel %vm526_vm2, %v1073_v18, %v525_v53 }
  0xed   : > { %v793_v58 = vpop.eup %792  ;;  %v530_v7 = vsel %vm528_vm3, %v529_v61, %v527_v56 }
  0xee   : > { %v795_v59 = vpop.eup %794  ;;  %v550_v63 = vmul.f32 %v793_v58, %v545_v32 }
  0xef   : > { %v557_v0 = vmul.f32 %v795_v59, %v546_v33 }
  0xf0   : > { %v552_v1 = vsel %vm551_vm4, %v545_v32, %v550_v63  ;;  %v797_v3 = vpop.eup %796 }
  0xf1   : > { %v555_v5 = vsel %vm553_vm5, %v554_v62, %v552_v1  ;;  %v559_v6 = vsel %vm558_vm6, %v546_v33, %v557_v0  ;;  %v564_v11 = vmul.f32 %v797_v3, %v547_v40  ;;  %v799_v12 = vpop.eup %798  ;;  %v575_v33 = vand.u32 2147483648, %v1084_v48 }
  0xf2   : > { %v585_v8 = vsub.f32 %v523_v4, %v555_v5  ;;  %v562_v9 = vsel %vm560_vm7, %v561_v2, %v559_v6  ;;  %v532_v20 = vmul.f32 %v799_v12, %v1079_v43 }
  0xf3   : > { %v586_v15 = vsub.f32 %v530_v7, %v562_v9  ;;  %v566_v21 = vsel %vm565_vm8, %v547_v40, %v564_v11 }
  0xf4   : > { %v589_v10 = vmul.f32 %v585_v8, %v585_v8  ;;  %v569_v18 = vsel %vm567_vm9, %v568_v16, %v566_v21  ;;  %v534_v26 = vsel %vm533_vm10, %v1079_v43, %v532_v20 }
  0xf5   : > { %v801_v23 = vpop.eup %800  ;;  %v590_v25 = vmul.f32 %v586_v15, %v586_v15  ;;  %v537_v28 = vsel %vm535_vm11, %v536_v22, %v534_v26 }
  0xf6   : > { %v803_v27 = vpop.eup %802  ;;  %v539_v29 = vmul.f32 %v801_v23, %v1082_v47  ;;  %v587_v30 = vsub.f32 %v537_v28, %v569_v18  ;;  %v593_v13 = vadd.f32 %v589_v10, %v581_v54 }
  0xf7   : > { %v571_v32 = vmul.f32 %v803_v27, %v1084_v48  ;;  %v594_v34 = vadd.f32 %v590_v25, %v582_v14 }
  0xf8   : > { %v541_v17 = vsel %vm540_vm12, %v1082_v47, %v539_v29  ;;  %v591_v35 = vmul.f32 %v587_v30, %v587_v30 }
  0xf9   : > { %v544_v36 = vsel %vm542_vm13, %v543_v31, %v541_v17  ;;  %v573_v37 = vsel %vm572_vm14, %v1084_v48, %v571_v32  ;;  %v597_v42 = vadd.f32 %v594_v34, %v593_v13 }
  0xfa   : > { %v576_v38 = vsel %vm574_vm15, %v575_v33, %v573_v37  ;;  %v595_v39 = vadd.f32 %v591_v35, %v583_v19 }
  0xfb   : > { %v588_v40 = vsub.f32 %v544_v36, %v576_v38 }
  0xfc   : > { %v598_v44 = vadd.f32 %v597_v42, %v595_v39 }
  0xfd   : > { %v592_v43 = vmul.f32 %v588_v40, %v588_v40 }
  0xff   : > { %v596_v45 = vadd.f32 %v592_v43, %v584_v41 }
 0x101   : > { %v599_v46 = vadd.f32 %v598_v44, %v596_v45 }
 0x103   : > { %v600_v47 = vrot.slane %v599_v46, 4 }
 0x105   : > { %v601_v49 = vadd.f32 %v600_v47, %v599_v46 }
 0x107   : > { %v602_v50 = vrot.slane %v601_v49, 2 }
 0x109   : > { %v603_v51 = vadd.f32 %v602_v50, %v601_v49 }
 0x10b   : > { %v604_v53 = vrot.slane %v603_v51, 1 }
 0x10d   : > { %v605_v54 = vadd.f32 %v604_v53, %v603_v51 }
 0x10f   : > { %v606_v48 = vmul.f32 0.03125, %v605_v54 }
 0x111   : > { %608 = vst.msk [vmem:[%s225_s8] sm:$0x1] %vm607_vm0, %v606_v48 }
 0x112 PF: > { %s18_s14 = sadd.s32 1, %s914_s14   ;;  %s1152_s9 = smov %s898_s10 }
 0x113   : > { %p15_p9 = scmp.ge.s32.totalorder %s18_s14, 4   ;;  %s1153_s10 = smov %s902_s11 }
 0x114   : > { %s1154_s11 = smov %s984_s21  ;;  %s1155_s12 = smov %s910_s13 }
 0x115   : > { %s1156_s13 = smov %s1158_s16  ;;  %17 = sbr.rel (!%p15_p9) target bundleno = 6 (0x6), region = 89 }
 0x11a   :  { %626 = vsyncpa [#allocation7], 1 }
 0x11b   :  { %628 = vsyncpa [#allocation7 + $0x1], 1 }
 0x11c   :  { %629 = vsyncpa [#allocation9], 1 }
 0x11d   :  { %631 = vsyncpa [#allocation9 + $0x1], 1 }

</bundles_post_ra>
